<compile_context>
chip_gen: v6e
topology: v6e:2x2x1
jax: 0.10.0
libtpu: 0.0.40
codegen_flags: <defaults>
</compile_context>

<pallas_src>
import functools

import jax
import jax.numpy as jnp
from jax.experimental import pallas as pl
from jax.experimental.pallas import tpu as pltpu


def transe_kernel(h_idx_ref, r_idx_ref, t_idx_ref,   # (1, 1, TB) int32 index tiles
                  iota_ref,                          # (E+R, TB) int32, resident
                  tab_hi_ref, tab_lo_ref,            # (D, E+R) bf16, resident
                  o_ref):                            # (1, 1, TB) float32 scores
    h_idx = h_idx_ref[0]                             # (1, TB)
    r_idx = r_idx_ref[0]                             # (1, TB), already offset by E
    t_idx = t_idx_ref[0]                             # (1, TB)
    iota = iota_ref[...]                             # (E+R, TB)

    # Signed selection matrix in {-1, 0, +1}: one column per triple selects
    # +head, +relation, -tail rows of the combined table. Exact in bf16.
    sel = ((iota == h_idx).astype(jnp.bfloat16)
           + (iota == r_idx).astype(jnp.bfloat16)
           - (iota == t_idx).astype(jnp.bfloat16))   # (E+R, TB)

    # 2-pass hi/lo bf16 matmul, f32 accumulation: (D, E+R) @ (E+R, TB) -> (D, TB)
    # gives (h + r - t) directly in transposed layout.
    hmr = (jnp.dot(tab_hi_ref[...], sel, preferred_element_type=jnp.float32)
           + jnp.dot(tab_lo_ref[...], sel, preferred_element_type=jnp.float32))

    # Sublane reduction over D -> lane-dense (1, TB) row of L2 norms.
    o_ref[0] = jnp.sqrt(jnp.sum(hmr * hmr, axis=0, keepdims=True))


@functools.partial(jax.jit, static_argnames=("tile_b",))
def transe_forward(entity_emb, relation_emb, heads, relations, tails,
                   tile_b=256):
    """Pallas TransE forward: scores of shape [B], float32."""
    assert tile_b % 128 == 0, "tile_b must be a multiple of 128 (lane width)"
    B = heads.shape[0]
    E, D = entity_emb.shape
    R = relation_emb.shape[0]
    EpR = E + R

    num_tiles = pl.cdiv(B, tile_b)
    padded_b = num_tiles * tile_b

    def prep_idx(x, offset=0):
        x = x.astype(jnp.int32) + offset
        if padded_b != B:
            x = jnp.pad(x, (0, padded_b - B))        # pad with a valid id
        return x.reshape(num_tiles, 1, tile_b)

    h3 = prep_idx(heads)
    r3 = prep_idx(relations, offset=E)               # relation rows live at [E, E+R)
    t3 = prep_idx(tails)

    # Combined (entity ++ relation) table, transposed once outside the kernel,
    # split into an exact-enough bf16 hi/lo pair (relative error ~2^-18).
    combined_t = jnp.concatenate(
        [entity_emb.astype(jnp.float32), relation_emb.astype(jnp.float32)],
        axis=0).T                                    # (D, E+R)
    tab_hi = combined_t.astype(jnp.bfloat16)
    tab_lo = (combined_t - tab_hi.astype(jnp.float32)).astype(jnp.bfloat16)

    # Loop-invariant row-index iota, passed in once as a resident input.
    sel_iota = jax.lax.broadcasted_iota(jnp.int32, (EpR, tile_b), 0)

    # Generation-aware VMEM budget: resident tables + iota (double-buffer
    # worst case) + per-step working set, capped at ~75% of physical VMEM.
    table_bytes = 2 * 2 * D * EpR                    # two bf16 tables
    iota_bytes = 4 * EpR * tile_b
    work_bytes = 2 * EpR * tile_b + 8 * D * tile_b + (4 << 20)
    want = 2 * (table_bytes + iota_bytes) + work_bytes
    try:
        cap = int(getattr(pltpu.get_tpu_info(), "vmem_capacity_bytes", 64 << 20))
    except Exception:
        cap = 64 << 20
    vmem_limit = int(min(max(want, 32 << 20), (3 * cap) // 4))

    grid_spec = pltpu.PrefetchScalarGridSpec(
        num_scalar_prefetch=0,
        grid=(num_tiles,),
        in_specs=[
            pl.BlockSpec((1, 1, tile_b), lambda i: (i, 0, 0)),   # head ids
            pl.BlockSpec((1, 1, tile_b), lambda i: (i, 0, 0)),   # relation ids (+E)
            pl.BlockSpec((1, 1, tile_b), lambda i: (i, 0, 0)),   # tail ids
            pl.BlockSpec((EpR, tile_b), lambda i: (0, 0)),       # iota, resident
            pl.BlockSpec((D, EpR), lambda i: (0, 0)),            # table hi, resident
            pl.BlockSpec((D, EpR), lambda i: (0, 0)),            # table lo, resident
        ],
        out_specs=pl.BlockSpec((1, 1, tile_b), lambda i: (i, 0, 0)),
    )

    out = pl.pallas_call(
        transe_kernel,
        out_shape=jax.ShapeDtypeStruct((num_tiles, 1, tile_b), jnp.float32),
        grid_spec=grid_spec,
        compiler_params=pltpu.CompilerParams(
            dimension_semantics=("parallel",),
            vmem_limit_bytes=vmem_limit),
    )(h3, r3, t3, sel_iota, tab_hi, tab_lo)

    return out.reshape(padded_b)[:B]


def xavier_uniform(key, shape, dtype=jnp.float32):
    fan_in, fan_out = shape[0], shape[1]
    bound = jnp.sqrt(6.0 / (fan_in + fan_out))
    return jax.random.uniform(key, shape, dtype, minval=-bound, maxval=bound)


if __name__ == "__main__":
    num_entities, num_relations, embedding_dim = 32, 8, 128
    batch = 8

    root = jax.random.PRNGKey(0)
    k_ent, k_rel, k_h, k_r, k_t = jax.random.split(root, 5)

    # deterministic parameter init (mirrors nn.init.xavier_uniform_ on the
    # Embedding weights)
    entity_emb = xavier_uniform(k_ent, (num_entities, embedding_dim))
    relation_emb = xavier_uniform(k_rel, (num_relations, embedding_dim))

    heads = jax.random.randint(k_h, (batch,), 0, num_entities, dtype=jnp.int32)
    relations = jax.random.randint(k_r, (batch,), 0, num_relations, dtype=jnp.int32)
    tails = jax.random.randint(k_t, (batch,), 0, num_entities, dtype=jnp.int32)

    scores = transe_forward(entity_emb, relation_emb, heads, relations, tails)
    scores = jax.block_until_ready(scores)

    # pure-JAX reference of the same forward pass
    ref = jnp.linalg.norm(
        entity_emb[heads] + relation_emb[relations] - entity_emb[tails],
        ord=2, axis=1)

    assert scores.shape == (batch,)
    assert jnp.allclose(scores, ref, atol=1e-3, rtol=1e-3), (scores, ref)
    print("KERNEL_OK")
</pallas_src>

<mosaic_0001>
module attributes {stable_mosaic.version = 11 : i64} {
  func.func @transe_kernel(%arg0: i32, %arg1: memref<1x1x256xi32, #tpu.memory_space<vmem>>, %arg2: memref<1x1x256xi32, #tpu.memory_space<vmem>>, %arg3: memref<1x1x256xi32, #tpu.memory_space<vmem>>, %arg4: memref<40x256xi32, #tpu.memory_space<vmem>>, %arg5: memref<128x40xbf16, #tpu.memory_space<vmem>>, %arg6: memref<128x40xbf16, #tpu.memory_space<vmem>>, %arg7: memref<1x1x256xf32, #tpu.memory_space<vmem>>) attributes {dimension_semantics = [#tpu.dimension_semantics<parallel>], iteration_bounds = array<i64: 1>, scalar_prefetch = 0 : i64, scratch_operands = 0 : i64, tpu.core_type = #tpu.core_type<tc>, window_params = [{transform_indices = @transform_0, window_bounds = array<i64: 1, 1, 256>}, {transform_indices = @transform_1, window_bounds = array<i64: 1, 1, 256>}, {transform_indices = @transform_2, window_bounds = array<i64: 1, 1, 256>}, {pipeline_mode = #tpu.pipeline_mode<synchronous>, transform_indices = @transform_3, window_bounds = array<i64: 40, 256>}, {pipeline_mode = #tpu.pipeline_mode<synchronous>, transform_indices = @transform_4, window_bounds = array<i64: 128, 40>}, {pipeline_mode = #tpu.pipeline_mode<synchronous>, transform_indices = @transform_5, window_bounds = array<i64: 128, 40>}, {transform_indices = @transform_6, window_bounds = array<i64: 1, 1, 256>}]} {
    %c0 = arith.constant 0 : index
    %c0_0 = arith.constant 0 : index
    %c0_1 = arith.constant 0 : index
    %0 = vector.load %arg1[%c0, %c0_0, %c0_1] : memref<1x1x256xi32, #tpu.memory_space<vmem>>, vector<1x1x256xi32>
    %1 = vector.shape_cast %0 : vector<1x1x256xi32> to vector<1x256xi32>
    %c0_2 = arith.constant 0 : index
    %c0_3 = arith.constant 0 : index
    %c0_4 = arith.constant 0 : index
    %2 = vector.load %arg2[%c0_2, %c0_3, %c0_4] : memref<1x1x256xi32, #tpu.memory_space<vmem>>, vector<1x1x256xi32>
    %3 = vector.shape_cast %2 : vector<1x1x256xi32> to vector<1x256xi32>
    %c0_5 = arith.constant 0 : index
    %c0_6 = arith.constant 0 : index
    %c0_7 = arith.constant 0 : index
    %4 = vector.load %arg3[%c0_5, %c0_6, %c0_7] : memref<1x1x256xi32, #tpu.memory_space<vmem>>, vector<1x1x256xi32>
    %5 = vector.shape_cast %4 : vector<1x1x256xi32> to vector<1x256xi32>
    %c0_8 = arith.constant 0 : index
    %c0_9 = arith.constant 0 : index
    %6 = vector.load %arg4[%c0_8, %c0_9] : memref<40x256xi32, #tpu.memory_space<vmem>>, vector<40x256xi32>
    %7 = vector.broadcast %1 : vector<1x256xi32> to vector<40x256xi32>
    %8 = arith.cmpi eq, %6, %7 : vector<40x256xi32>
    %9 = arith.extui %8 : vector<40x256xi1> to vector<40x256xi32>
    %10 = arith.sitofp %9 : vector<40x256xi32> to vector<40x256xf32>
    %11 = arith.truncf %10 : vector<40x256xf32> to vector<40x256xbf16>
    %12 = vector.broadcast %3 : vector<1x256xi32> to vector<40x256xi32>
    %13 = arith.cmpi eq, %6, %12 : vector<40x256xi32>
    %14 = arith.extui %13 : vector<40x256xi1> to vector<40x256xi32>
    %15 = arith.sitofp %14 : vector<40x256xi32> to vector<40x256xf32>
    %16 = arith.truncf %15 : vector<40x256xf32> to vector<40x256xbf16>
    %17 = arith.addf %11, %16 : vector<40x256xbf16>
    %18 = vector.broadcast %5 : vector<1x256xi32> to vector<40x256xi32>
    %19 = arith.cmpi eq, %6, %18 : vector<40x256xi32>
    %20 = arith.extui %19 : vector<40x256xi1> to vector<40x256xi32>
    %21 = arith.sitofp %20 : vector<40x256xi32> to vector<40x256xf32>
    %22 = arith.truncf %21 : vector<40x256xf32> to vector<40x256xbf16>
    %23 = arith.subf %17, %22 : vector<40x256xbf16>
    %c0_10 = arith.constant 0 : index
    %c0_11 = arith.constant 0 : index
    %24 = vector.load %arg5[%c0_10, %c0_11] : memref<128x40xbf16, #tpu.memory_space<vmem>>, vector<128x40xbf16>
    %cst = arith.constant dense<0.000000e+00> : vector<128x256xf32>
    %25 = tpu.matmul %24, %23, %cst {dimension_numbers = #tpu.dot_dimension_numbers<[1], [0], [0], [1], [0, 0, 1, 1], [], []>} : vector<128x40xbf16>, vector<40x256xbf16>, vector<128x256xf32> -> vector<128x256xf32>
    %c0_12 = arith.constant 0 : index
    %c0_13 = arith.constant 0 : index
    %26 = vector.load %arg6[%c0_12, %c0_13] : memref<128x40xbf16, #tpu.memory_space<vmem>>, vector<128x40xbf16>
    %cst_14 = arith.constant dense<0.000000e+00> : vector<128x256xf32>
    %27 = tpu.matmul %26, %23, %cst_14 {dimension_numbers = #tpu.dot_dimension_numbers<[1], [0], [0], [1], [0, 0, 1, 1], [], []>} : vector<128x40xbf16>, vector<40x256xbf16>, vector<128x256xf32> -> vector<128x256xf32>
    %28 = arith.addf %25, %27 : vector<128x256xf32>
    %29 = arith.mulf %28, %28 : vector<128x256xf32>
    %cst_15 = arith.constant dense<0.000000e+00> : vector<256xf32>
    %30 = vector.multi_reduction <add>, %29, %cst_15 [0] : vector<128x256xf32> to vector<256xf32>
    %31 = vector.shape_cast %30 : vector<256xf32> to vector<1x256xf32>
    %32 = math.sqrt %31 : vector<1x256xf32>
    %c0_16 = arith.constant 0 : index
    %c0_17 = arith.constant 0 : index
    %c0_18 = arith.constant 0 : index
    %33 = vector.load %arg7[%c0_16, %c0_17, %c0_18] : memref<1x1x256xf32, #tpu.memory_space<vmem>>, vector<1x1x256xf32>
    %34 = vector.shape_cast %33 : vector<1x1x256xf32> to vector<1x256xf32>
    %35 = vector.shape_cast %32 : vector<1x256xf32> to vector<1x1x256xf32>
    tpu.vector_store %arg7[%c0_16, %c0_17, %c0_18], %35 {strides = array<i32>} : memref<1x1x256xf32, #tpu.memory_space<vmem>>, vector<1x1x256xf32>,
    return
  }
  func.func @transform_0(%arg0: i32) -> (i32, i32, i32) {
    %c0_i32 = arith.constant 0 : i32
    %c0_i32_0 = arith.constant 0 : i32
    %c0_i32_1 = arith.constant 0 : i32
    return %arg0, %c0_i32, %c0_i32_0 : i32, i32, i32
  }
  func.func @transform_1(%arg0: i32) -> (i32, i32, i32) {
    %c0_i32 = arith.constant 0 : i32
    %c0_i32_0 = arith.constant 0 : i32
    %c0_i32_1 = arith.constant 0 : i32
    return %arg0, %c0_i32, %c0_i32_0 : i32, i32, i32
  }
  func.func @transform_2(%arg0: i32) -> (i32, i32, i32) {
    %c0_i32 = arith.constant 0 : i32
    %c0_i32_0 = arith.constant 0 : i32
    %c0_i32_1 = arith.constant 0 : i32
    return %arg0, %c0_i32, %c0_i32_0 : i32, i32, i32
  }
  func.func @transform_3(%arg0: i32) -> (i32, i32) {
    %c0_i32 = arith.constant 0 : i32
    %c0_i32_0 = arith.constant 0 : i32
    %c0_i32_1 = arith.constant 0 : i32
    return %c0_i32, %c0_i32_0 : i32, i32
  }
  func.func @transform_4(%arg0: i32) -> (i32, i32) {
    %c0_i32 = arith.constant 0 : i32
    %c0_i32_0 = arith.constant 0 : i32
    %c0_i32_1 = arith.constant 0 : i32
    return %c0_i32, %c0_i32_0 : i32, i32
  }
  func.func @transform_5(%arg0: i32) -> (i32, i32) {
    %c0_i32 = arith.constant 0 : i32
    %c0_i32_0 = arith.constant 0 : i32
    %c0_i32_1 = arith.constant 0 : i32
    return %c0_i32, %c0_i32_0 : i32, i32
  }
  func.func @transform_6(%arg0: i32) -> (i32, i32, i32) {
    %c0_i32 = arith.constant 0 : i32
    %c0_i32_0 = arith.constant 0 : i32
    %c0_i32_1 = arith.constant 0 : i32
    return %arg0, %c0_i32, %c0_i32_0 : i32, i32, i32
  }
}

</mosaic_0001>

<bundles_post_ra>
// kernel: transe_forward.1
= control target key start
LH: loop header
LB: loop body
LE: loop exit
PB: predicated region body
PF: predicated region fallthrough
CT: control target
= control target key end

     0   :  { %v37_v0 = vlaneseq  ;;  %v777_v5 = vmov 0   ;;  %vm278_vm0 = vcmask 1043456   ;;  %v778_v18 = vmov 0.0   ;;  %s1019_s0 = inlined_call_operand.vmem [shape: s32[1,1,256], index: 0, kind: input, shape index: {}]   ;;  %s1020_s1 = inlined_call_operand.vmem [shape: s32[1,1,256], index: 1, kind: input, shape index: {}]   ;;  %s1021_s2 = inlined_call_operand.vmem [shape: s32[1,1,256], index: 2, kind: input, shape index: {}]   ;;  %s1022_s3 = inlined_call_operand.vmem [shape: s32[40,256], index: 3, kind: input, shape index: {}]   ;;  %s1023_s5 = inlined_call_operand.vmem [shape: bf16[128,40], index: 5, kind: input, shape index: {}]   ;;  %s1024_s4 = inlined_call_operand.vmem [shape: bf16[128,40], index: 4, kind: input, shape index: {}]   ;;  %s1025_s6 = inlined_call_operand.vmem [shape: f32[1,1,256], index: 6, kind: output, shape index: {}]  }
   0x1   :  { %v24_v2 = vld [vmem:[%s1019_s0] sm:$0x3]  ;;  %317 = vmatprep.mubr.bf16.mxu0 %v777_v5  ;;  %494 = vmatprep.mubr.bf16.mxu1 %v777_v5  ;;  %v36_v6 = vld [vmem:[%s1022_s3 + $0x48] sm:$0xff]  ;;  %v34_v17 = vld [vmem:[%s1022_s3 + $0x38] sm:$0xff] }
   0x2   :  { %v816_v1 = vshrl.u32 %v37_v0, 7  ;;  %v25_v3 = vld [vmem:[%s1020_s1] sm:$0x3]  ;;  %v32_v16 = vld [vmem:[%s1022_s3 + $0x28] sm:$0xff]  ;;  %v33_v38 = vld [vmem:[%s1022_s3 + $0x30] sm:$0xff] }
   0x3   :  { %v26_v4 = vld [vmem:[%s1021_s2] sm:$0x3]  ;;  %v28_v47 = vld [vmem:[%s1022_s3 + $0x8] sm:$0xff]  ;;  %v30_v50 = vld [vmem:[%s1022_s3 + $0x18] sm:$0xff] }
   0x4   :  { %v43_v7 = vsub.s32 1, %v816_v1  ;;  %v39_v8 = vsub.s32 0, %v816_v1  ;;  %v35_v9 = vld [vmem:[%s1022_s3 + $0x40] sm:$0xff] }
   0x5   :  { %v31_v34 = vld [vmem:[%s1022_s3 + $0x20] sm:$0xff] }
   0x6   :  { %v837_v10 = vrot.slane %v24_v2, %v43_v7  ;;  %v839_v11 = vrot.slane %v25_v3, %v43_v7  ;;  %v841_v12 = vrot.slane %v26_v4, %v43_v7  ;;  %v843_v13 = vrot.slane %v24_v2, %v39_v8  ;;  %v27_v2 = vld [vmem:[%s1022_s3] sm:$0xff] }
   0x7   :  { %v845_v14 = vrot.slane %v25_v3, %v39_v8  ;;  %v847_v15 = vrot.slane %v26_v4, %v39_v8  ;;  %v29_v3 = vld [vmem:[%s1022_s3 + $0x10] sm:$0xff] }
   0x8   :  { %vm54_vm1 = vcmp.eq.s32.totalorder %v36_v6, %v837_v10  ;;  %vm98_vm2 = vcmp.eq.s32.totalorder %v36_v6, %v839_v11  ;;  %vm148_vm3 = vcmp.eq.s32.totalorder %v36_v6, %v841_v12  ;;  %vm53_vm4 = vcmp.eq.s32.totalorder %v35_v9, %v843_v13 }
   0x9   :  { %v699_v19 = vsel %vm54_vm1, 1.0, %v778_v18  ;;  %v709_v20 = vsel %vm98_vm2, 1.0, %v778_v18  ;;  %v719_v21 = vsel %vm148_vm3, 1.0, %v778_v18  ;;  %v698_v22 = vsel %vm53_vm4, 1.0, %v778_v18 }
   0xa   :  { %v80_v23 = vpack.c.bf16 %v699_v19, %v699_v19  ;;  %v124_v24 = vpack.c.bf16 %v709_v20, %v709_v20  ;;  %v174_v25 = vpack.c.bf16 %v719_v21, %v719_v21  ;;  %v79_v26 = vpack.c.bf16 %v698_v22, %v698_v22 }
   0xb   :  { %vm97_vm5 = vcmp.eq.s32.totalorder %v35_v9, %v845_v14  ;;  %vm147_vm6 = vcmp.eq.s32.totalorder %v35_v9, %v847_v15  ;;  %vm50_vm7 = vcmp.eq.s32.totalorder %v32_v16, %v837_v10  ;;  %vm52_vm8 = vcmp.eq.s32.totalorder %v34_v17, %v837_v10 }
   0xc   :  { %v130_v27 = vadd.bf16 %v124_v24, %v80_v23  ;;  %v708_v28 = vsel %vm97_vm5, 1.0, %v778_v18  ;;  %v718_v29 = vsel %vm147_vm6, 1.0, %v778_v18  ;;  %v695_v30 = vsel %vm50_vm7, 1.0, %v778_v18 }
   0xd   :  { %v123_v31 = vpack.c.bf16 %v708_v28, %v708_v28  ;;  %v173_v32 = vpack.c.bf16 %v718_v29, %v718_v29  ;;  %v697_v33 = vsel %vm52_vm8, 1.0, %v778_v18  ;;  %vm94_vm9 = vcmp.eq.s32.totalorder %v32_v16, %v839_v11  ;;  %v758_v28 = vld [vmem:[%s1024_s4] sm:$0xff]   ;;  %v761_v29 = vld [vmem:[%s1023_s5 + $0x10] sm:$0xff]  }
   0xe   :  { %v180_v35 = vsub.bf16 %v130_v27, %v174_v25  ;;  %v78_v36 = vpack.c.bf16 %v697_v33, %v695_v30  ;;  %vm96_vm10 = vcmp.eq.s32.totalorder %v34_v17, %v839_v11  ;;  %v705_v37 = vsel %vm94_vm9, 1.0, %v778_v18  ;;  %v757_v27 = vld [vmem:[%s1023_s5] sm:$0xff]   ;;  %v762_v30 = vld [vmem:[%s1024_s4 + $0x10] sm:$0xff]  }
   0xf   :  { %v129_v39 = vadd.bf16 %v123_v31, %v79_v26  ;;  %v707_v40 = vsel %vm96_vm10, 1.0, %v778_v18  ;;  %vm144_vm11 = vcmp.eq.s32.totalorder %v32_v16, %v841_v12  ;;  %vm146_vm12 = vcmp.eq.s32.totalorder %v34_v17, %v841_v12  ;;  %v763_v31 = vld [vmem:[%s1023_s5 + $0x18] sm:$0xff]   ;;  %v765_v33 = vld [vmem:[%s1023_s5 + $0x20] sm:$0xff]  }
  0x10   :  { %728 = vmatprep.subr.msk.bf16.mxu0 %vm278_vm0, %v180_v35  ;;  %745 = vmatprep.subr.msk.bf16.mxu1 %vm278_vm0, %v180_v35  ;;  %v122_v41 = vpack.c.bf16 %v707_v40, %v705_v37  ;;  %v715_v42 = vsel %vm144_vm11, 1.0, %v778_v18  ;;  %v717_v43 = vsel %vm146_vm12, 1.0, %v778_v18  ;;  %vm49_vm13 = vcmp.eq.s32.totalorder %v31_v34, %v843_v13  ;;  %v767_v35 = vld [vmem:[%s1023_s5 + $0x28] sm:$0xff]   ;;  %v769_v37 = vld [vmem:[%s1023_s5 + $0x30] sm:$0xff]   ;;  %v772_v40 = vld [vmem:[%s1024_s4 + $0x38] sm:$0xff]  }
  0x11   :  { %v179_v44 = vsub.bf16 %v129_v39, %v173_v32  ;;  %v172_v45 = vpack.c.bf16 %v717_v43, %v715_v42  ;;  %vm51_vm14 = vcmp.eq.s32.totalorder %v33_v38, %v843_v13  ;;  %v694_v46 = vsel %vm49_vm13, 1.0, %v778_v18  ;;  %v764_v32 = vld [vmem:[%s1024_s4 + $0x18] sm:$0xff]  }
  0x12   :  { %v128_v48 = vadd.bf16 %v122_v41, %v78_v36  ;;  %v696_v49 = vsel %vm51_vm14, 1.0, %v778_v18  ;;  %vm93_vm15 = vcmp.eq.s32.totalorder %v31_v34, %v845_v14  ;;  %vm95_vm1 = vcmp.eq.s32.totalorder %v33_v38, %v845_v14  ;;  %v768_v36 = vld [vmem:[%s1024_s4 + $0x28] sm:$0xff]   ;;  %v771_v39 = vld [vmem:[%s1023_s5 + $0x38] sm:$0xff]  }
  0x13   :  { %v280_v51 = vsel %vm278_vm0, %v179_v44, 0  ;;  %v77_v52 = vpack.c.bf16 %v696_v49, %v694_v46  ;;  %v704_v53 = vsel %vm93_vm15, 1.0, %v778_v18  ;;  %v706_v54 = vsel %vm95_vm1, 1.0, %v778_v18 }
  0x14   :  { %296 = vmatpush1.bf16.msra.mxu0 %v280_v51  ;;  %473 = vmatpush1.bf16.msra.mxu1 %v280_v51  ;;  %v178_v55 = vsub.bf16 %v128_v48, %v172_v45  ;;  %v121_v56 = vpack.c.bf16 %v706_v54, %v704_v53  ;;  %vm143_vm2 = vcmp.eq.s32.totalorder %v31_v34, %v847_v15  ;;  %vm253_vm15 = vcmask 326656   ;;  %v766_v34 = vld [vmem:[%s1024_s4 + $0x20] sm:$0xff]  }
  0x15   :  { %vm145_vm3 = vcmp.eq.s32.totalorder %v33_v38, %v847_v15  ;;  %v714_v57 = vsel %vm143_vm2, 1.0, %v778_v18  ;;  %vm46_vm4 = vcmp.eq.s32.totalorder %v28_v47, %v837_v10  ;;  %vm48_vm5 = vcmp.eq.s32.totalorder %v30_v50, %v837_v10  ;;  %v770_v38 = vld [vmem:[%s1024_s4 + $0x30] sm:$0xff]  }
  0x16   :  { %297 = vmatprep.subr.bf16.mxu0 %v178_v55  ;;  %474 = vmatprep.subr.bf16.mxu1 %v178_v55  ;;  %v127_v58 = vadd.bf16 %v121_v56, %v77_v52  ;;  %v716_v59 = vsel %vm145_vm3, 1.0, %v778_v18  ;;  %v691_v60 = vsel %vm46_vm4, 1.0, %v778_v18  ;;  %v693_v61 = vsel %vm48_vm5, 1.0, %v778_v18 }
  0x17   :  { %v171_v62 = vpack.c.bf16 %v716_v59, %v714_v57  ;;  %v76_v63 = vpack.c.bf16 %v693_v61, %v691_v60  ;;  %vm90_vm0 = vcmp.eq.s32.totalorder %v28_v47, %v839_v11  ;;  %vm92_vm6 = vcmp.eq.s32.totalorder %v30_v50, %v839_v11 }
  0x18   :  { %v701_v4 = vsel %vm90_vm0, 1.0, %v778_v18  ;;  %v703_v6 = vsel %vm92_vm6, 1.0, %v778_v18  ;;  %vm140_vm7 = vcmp.eq.s32.totalorder %v28_v47, %v841_v12  ;;  %vm142_vm8 = vcmp.eq.s32.totalorder %v30_v50, %v841_v12 }
  0x19   :  { %v177_v7 = vsub.bf16 %v127_v58, %v171_v62  ;;  %v120_v8 = vpack.c.bf16 %v703_v6, %v701_v4  ;;  %v711_v9 = vsel %vm140_vm7, 1.0, %v778_v18  ;;  %v713_v10 = vsel %vm142_vm8, 1.0, %v778_v18 }
  0x1a   :  { %v170_v11 = vpack.c.bf16 %v713_v10, %v711_v9  ;;  %vm45_vm9 = vcmp.eq.s32.totalorder %v27_v2, %v843_v13  ;;  %vm47_vm10 = vcmp.eq.s32.totalorder %v29_v3, %v843_v13  ;;  %vm89_vm11 = vcmp.eq.s32.totalorder %v27_v2, %v845_v14 }
  0x1b   :  { %298 = vmatpush1.bf16.msra.mxu0 %v177_v7  ;;  %475 = vmatpush1.bf16.msra.mxu1 %v177_v7  ;;  %v126_v16 = vadd.bf16 %v120_v8, %v76_v63  ;;  %v690_v17 = vsel %vm45_vm9, 1.0, %v778_v18  ;;  %v692_v12 = vsel %vm47_vm10, 1.0, %v778_v18  ;;  %vm91_vm12 = vcmp.eq.s32.totalorder %v29_v3, %v845_v14 }
  0x1c   :  { %v75_v19 = vpack.c.bf16 %v692_v12, %v690_v17  ;;  %v700_v20 = vsel %vm89_vm11, 1.0, %v778_v18  ;;  %v702_v21 = vsel %vm91_vm12, 1.0, %v778_v18  ;;  %vm139_vm13 = vcmp.eq.s32.totalorder %v27_v2, %v847_v15 }
  0x1d   :  { %v176_v22 = vsub.bf16 %v126_v16, %v170_v11  ;;  %v119_v13 = vpack.c.bf16 %v702_v21, %v700_v20  ;;  %vm141_vm14 = vcmp.eq.s32.totalorder %v29_v3, %v847_v15  ;;  %v710_v23 = vsel %vm139_vm13, 1.0, %v778_v18  ;;  %v759_v15 = vld [vmem:[%s1023_s5 + $0x8] sm:$0xff]  }
  0x1e   :  { %v712_v24 = vsel %vm141_vm14, 1.0, %v778_v18  ;;  %v760_v18 = vld [vmem:[%s1024_s4 + $0x8] sm:$0xff]   ;;  %vm683_vm5 = vcmp.lt.s32.totalorder %v37_v0, 256 }
  0x1f   :  { %299 = vmatprep.subr.bf16.mxu0 %v176_v22  ;;  %476 = vmatprep.subr.bf16.mxu1 %v176_v22  ;;  %v125_v25 = vadd.bf16 %v119_v13, %v75_v19  ;;  %v169_v26 = vpack.c.bf16 %v712_v24, %v710_v23 }
  0x21   :  { %v175_v14 = vsub.bf16 %v125_v25, %v169_v26 }
  0x23   :  { %300 = vmatpush1.bf16.msra.mxu0 %v175_v14  ;;  %477 = vmatpush1.bf16.msra.mxu1 %v175_v14 }
  0x26   :  { %729 = vmatmul.mubr.msk.bf16.vlgmr.msra.gmra.mxu0 %vm253_vm15, %v757_v27  ;;  %746 = vmatmul.mubr.msk.bf16.vlgmr.msra.gmra.mxu1 %vm253_vm15, %v758_v28 }
  0x27   :  { %327 = vmatprep.mubr.bf16.mxu0 %v777_v5  ;;  %504 = vmatprep.mubr.bf16.mxu1 %v777_v5 }
  0x2e   :  { %730 = vmatmul.mubr.msk.bf16.gmra.mxu0 %vm253_vm15, %v759_v15  ;;  %747 = vmatmul.mubr.msk.bf16.gmra.mxu1 %vm253_vm15, %v760_v18 }
  0x2f   :  { %337 = vmatprep.mubr.bf16.mxu0 %v777_v5  ;;  %514 = vmatprep.mubr.bf16.mxu1 %v777_v5 }
  0x36   :  { %731 = vmatmul.mubr.msk.bf16.gmra.mxu0 %vm253_vm15, %v761_v29  ;;  %748 = vmatmul.mubr.msk.bf16.gmra.mxu1 %vm253_vm15, %v762_v30 }
  0x37   :  { %347 = vmatprep.mubr.bf16.mxu0 %v777_v5  ;;  %524 = vmatprep.mubr.bf16.mxu1 %v777_v5 }
  0x3e   :  { %732 = vmatmul.mubr.msk.bf16.gmra.mxu0 %vm253_vm15, %v763_v31  ;;  %749 = vmatmul.mubr.msk.bf16.gmra.mxu1 %vm253_vm15, %v764_v32 }
  0x3f   :  { %357 = vmatprep.mubr.bf16.mxu0 %v777_v5  ;;  %534 = vmatprep.mubr.bf16.mxu1 %v777_v5 }
  0x46   :  { %733 = vmatmul.mubr.msk.bf16.gmra.mxu0 %vm253_vm15, %v765_v33  ;;  %750 = vmatmul.mubr.msk.bf16.gmra.mxu1 %vm253_vm15, %v766_v34 }
  0x47   :  { %367 = vmatprep.mubr.bf16.mxu0 %v777_v5  ;;  %544 = vmatprep.mubr.bf16.mxu1 %v777_v5 }
  0x4e   :  { %734 = vmatmul.mubr.msk.bf16.gmra.mxu0 %vm253_vm15, %v767_v35  ;;  %751 = vmatmul.mubr.msk.bf16.gmra.mxu1 %vm253_vm15, %v768_v36 }
  0x4f   :  { %377 = vmatprep.mubr.bf16.mxu0 %v777_v5  ;;  %554 = vmatprep.mubr.bf16.mxu1 %v777_v5 }
  0x56   :  { %735 = vmatmul.mubr.msk.bf16.gmra.mxu0 %vm253_vm15, %v769_v37  ;;  %752 = vmatmul.mubr.msk.bf16.gmra.mxu1 %vm253_vm15, %v770_v38 }
  0x57   :  { %387 = vmatprep.mubr.bf16.mxu0 %v777_v5  ;;  %564 = vmatprep.mubr.bf16.mxu1 %v777_v5 }
  0x5e   :  { %736 = vmatmul.mubr.msk.bf16.gmra.mxu0 %vm253_vm15, %v771_v39  ;;  %753 = vmatmul.mubr.msk.bf16.gmra.mxu1 %vm253_vm15, %v772_v40 }
  0xe6   :  { %v319_v41 = vpop.f32.mrf.mxu0  ;;  %v496_v42 = vpop.f32.mrf.mxu1 }
  0xe7   :  { %v497_v17 = vadd.f32 %v496_v42, %v319_v41 }
  0xe8   :  { %v321_v43 = vpop.f32.mrf.mxu0  ;;  %v498_v44 = vpop.f32.mrf.mxu1 }
  0xe9   :  { %v499_v19 = vadd.f32 %v498_v44, %v321_v43  ;;  %v575_v27 = vmul.f32 %v497_v17, %v497_v17 }
  0xea   :  { %v323_v45 = vpop.f32.mrf.mxu0  ;;  %v500_v46 = vpop.f32.mrf.mxu1 }
  0xeb   :  { %v501_v9 = vadd.f32 %v500_v46, %v323_v45  ;;  %v576_v18 = vmul.f32 %v499_v19, %v499_v19 }
  0xec   :  { %v325_v47 = vpop.f32.mrf.mxu0  ;;  %v502_v5 = vpop.f32.mrf.mxu1 }
  0xed   :  { %v503_v10 = vadd.f32 %v502_v5, %v325_v47  ;;  %v577_v13 = vmul.f32 %v501_v9, %v501_v9 }
  0xee   :  { %v329_v48 = vpop.f32.mrf.mxu0  ;;  %v506_v49 = vpop.f32.mrf.mxu1 }
  0xef   :  { %v507_v12 = vadd.f32 %v506_v49, %v329_v48  ;;  %v578_v24 = vmul.f32 %v503_v10, %v503_v10  ;;  %v607_v33 = vadd.f32 %v577_v13, %v575_v27 }
  0xf0   :  { %v331_v50 = vpop.f32.mrf.mxu0  ;;  %v508_v51 = vpop.f32.mrf.mxu1 }
  0xf1   :  { %v509_v20 = vadd.f32 %v508_v51, %v331_v50  ;;  %v579_v28 = vmul.f32 %v507_v12, %v507_v12  ;;  %v628_v36 = vadd.f32 %v578_v24, %v576_v18 }
  0xf2   :  { %v333_v52 = vpop.f32.mrf.mxu0  ;;  %v510_v53 = vpop.f32.mrf.mxu1 }
  0xf3   :  { %v511_v23 = vadd.f32 %v510_v53, %v333_v52  ;;  %v580_v29 = vmul.f32 %v509_v20, %v509_v20  ;;  %v608_v41 = vadd.f32 %v607_v33, %v579_v28 }
  0xf4   :  { %v335_v54 = vpop.f32.mrf.mxu0  ;;  %v512_v55 = vpop.f32.mrf.mxu1 }
  0xf5   :  { %v513_v25 = vadd.f32 %v512_v55, %v335_v54  ;;  %v581_v34 = vmul.f32 %v511_v23, %v511_v23  ;;  %v629_v44 = vadd.f32 %v628_v36, %v580_v29 }
  0xf6   :  { %v339_v56 = vpop.f32.mrf.mxu0  ;;  %v516_v57 = vpop.f32.mrf.mxu1 }
  0xf7   :  { %v517_v15 = vadd.f32 %v516_v57, %v339_v56  ;;  %v582_v37 = vmul.f32 %v513_v25, %v513_v25  ;;  %v609_v48 = vadd.f32 %v608_v41, %v581_v34 }
  0xf8   :  { %v341_v58 = vpop.f32.mrf.mxu0  ;;  %v518_v59 = vpop.f32.mrf.mxu1 }
  0xf9   :  { %v519_v30 = vadd.f32 %v518_v59, %v341_v58  ;;  %v583_v42 = vmul.f32 %v517_v15, %v517_v15  ;;  %v630_v51 = vadd.f32 %v629_v44, %v582_v37 }
  0xfa   :  { %v343_v60 = vpop.f32.mrf.mxu0  ;;  %v520_v61 = vpop.f32.mrf.mxu1 }
  0xfb   :  { %v521_v35 = vadd.f32 %v520_v61, %v343_v60  ;;  %v584_v45 = vmul.f32 %v519_v30, %v519_v30  ;;  %v610_v56 = vadd.f32 %v609_v48, %v583_v42 }
  0xfc   :  { %v345_v62 = vpop.f32.mrf.mxu0  ;;  %v522_v63 = vpop.f32.mrf.mxu1 }
  0xfd   :  { %v523_v38 = vadd.f32 %v522_v63, %v345_v62  ;;  %v585_v49 = vmul.f32 %v521_v35, %v521_v35  ;;  %v631_v59 = vadd.f32 %v630_v51, %v584_v45 }
  0xfe   :  { %v349_v2 = vpop.f32.mrf.mxu0  ;;  %v526_v3 = vpop.f32.mrf.mxu1 }
  0xff   :  { %v527_v43 = vadd.f32 %v526_v3, %v349_v2  ;;  %v586_v52 = vmul.f32 %v523_v38, %v523_v38  ;;  %v611_v2 = vadd.f32 %v610_v56, %v585_v49 }
 0x100   :  { %v351_v4 = vpop.f32.mrf.mxu0  ;;  %v528_v6 = vpop.f32.mrf.mxu1 }
 0x101   :  { %v529_v46 = vadd.f32 %v528_v6, %v351_v4  ;;  %v587_v57 = vmul.f32 %v527_v43, %v527_v43  ;;  %v632_v6 = vadd.f32 %v631_v59, %v586_v52 }
 0x102   :  { %v353_v7 = vpop.f32.mrf.mxu0  ;;  %v530_v8 = vpop.f32.mrf.mxu1 }
 0x103   :  { %v531_v50 = vadd.f32 %v530_v8, %v353_v7  ;;  %v588_v60 = vmul.f32 %v529_v46, %v529_v46  ;;  %v612_v17 = vadd.f32 %v611_v2, %v587_v57 }
 0x104   :  { %v355_v11 = vpop.f32.mrf.mxu0  ;;  %v532_v16 = vpop.f32.mrf.mxu1 }
 0x105   :  { %v533_v53 = vadd.f32 %v532_v16, %v355_v11  ;;  %v589_v3 = vmul.f32 %v531_v50, %v531_v50  ;;  %v633_v12 = vadd.f32 %v632_v6, %v588_v60 }
 0x106   :  { %v359_v21 = vpop.f32.mrf.mxu0  ;;  %v536_v22 = vpop.f32.mrf.mxu1 }
 0x107   :  { %v537_v58 = vadd.f32 %v536_v22, %v359_v21  ;;  %v590_v9 = vmul.f32 %v533_v53, %v533_v53  ;;  %v613_v13 = vadd.f32 %v612_v17, %v589_v3 }
 0x108   :  { %v361_v26 = vpop.f32.mrf.mxu0  ;;  %v538_v14 = vpop.f32.mrf.mxu1 }
 0x109   :  { %v539_v61 = vadd.f32 %v538_v14, %v361_v26  ;;  %v591_v11 = vmul.f32 %v537_v58, %v537_v58  ;;  %v634_v25 = vadd.f32 %v633_v12, %v590_v9 }
 0x10a   :  { %v363_v31 = vpop.f32.mrf.mxu0  ;;  %v540_v32 = vpop.f32.mrf.mxu1 }
 0x10b   :  { %v541_v4 = vadd.f32 %v540_v32, %v363_v31  ;;  %v592_v19 = vmul.f32 %v539_v61, %v539_v61  ;;  %v614_v15 = vadd.f32 %v613_v13, %v591_v11 }
 0x10c   :  { %v365_v39 = vpop.f32.mrf.mxu0  ;;  %v542_v40 = vpop.f32.mrf.mxu1 }
 0x10d   :  { %v543_v10 = vadd.f32 %v542_v40, %v365_v39  ;;  %v593_v23 = vmul.f32 %v541_v4, %v541_v4  ;;  %v635_v30 = vadd.f32 %v634_v25, %v592_v19 }
 0x10e   :  { %v369_v47 = vpop.f32.mrf.mxu0  ;;  %v546_v5 = vpop.f32.mrf.mxu1 }
 0x10f   :  { %v547_v16 = vadd.f32 %v546_v5, %v369_v47  ;;  %v594_v26 = vmul.f32 %v543_v10, %v543_v10  ;;  %v615_v34 = vadd.f32 %v614_v15, %v593_v23 }
 0x110   :  { %v371_v54 = vpop.f32.mrf.mxu0  ;;  %v548_v55 = vpop.f32.mrf.mxu1 }
 0x111   :  { %v549_v20 = vadd.f32 %v548_v55, %v371_v54  ;;  %v595_v18 = vmul.f32 %v547_v16, %v547_v16  ;;  %v636_v38 = vadd.f32 %v635_v30, %v594_v26 }
 0x112   :  { %v373_v62 = vpop.f32.mrf.mxu0  ;;  %v550_v63 = vpop.f32.mrf.mxu1 }
 0x113   :  { %v551_v24 = vadd.f32 %v550_v63, %v373_v62  ;;  %v596_v31 = vmul.f32 %v549_v20, %v549_v20  ;;  %v616_v42 = vadd.f32 %v615_v34, %v595_v18 }
 0x114   :  { %v375_v7 = vpop.f32.mrf.mxu0  ;;  %v552_v8 = vpop.f32.mrf.mxu1 }
 0x115   :  { %v553_v14 = vadd.f32 %v552_v8, %v375_v7  ;;  %v597_v35 = vmul.f32 %v551_v24, %v551_v24  ;;  %v637_v45 = vadd.f32 %v636_v38, %v596_v31 }
 0x116   :  { %v379_v21 = vpop.f32.mrf.mxu0  ;;  %v556_v22 = vpop.f32.mrf.mxu1 }
 0x117   :  { %v557_v29 = vadd.f32 %v556_v22, %v379_v21  ;;  %v598_v39 = vmul.f32 %v553_v14, %v553_v14  ;;  %v617_v5 = vadd.f32 %v616_v42, %v597_v35 }
 0x118   :  { %v381_v27 = vpop.f32.mrf.mxu0  ;;  %v558_v28 = vpop.f32.mrf.mxu1 }
 0x119   :  { %v559_v36 = vadd.f32 %v558_v28, %v381_v27  ;;  %v599_v43 = vmul.f32 %v557_v29, %v557_v29  ;;  %v638_v51 = vadd.f32 %v637_v45, %v598_v39  ;;  %v779_v27 = vmov 1966171168  }
 0x11a   :  { %v383_v32 = vpop.f32.mrf.mxu0  ;;  %v560_v33 = vpop.f32.mrf.mxu1  ;;  %v667_v28 = vunpack.c.l.s4 %v779_v27 }
 0x11b   :  { %v561_v37 = vadd.f32 %v560_v33, %v383_v32  ;;  %v600_v48 = vmul.f32 %v559_v36, %v559_v36  ;;  %v618_v54 = vadd.f32 %v617_v5, %v599_v43 }
 0x11c   :  { %v385_v40 = vpop.f32.mrf.mxu0  ;;  %v562_v41 = vpop.f32.mrf.mxu1  ;;  %v668_v29 = vunpack.c.0.s8 %v667_v28 }
 0x11d   :  { %v563_v44 = vadd.f32 %v562_v41, %v385_v40  ;;  %v601_v49 = vmul.f32 %v561_v37, %v561_v37  ;;  %v639_v60 = vadd.f32 %v638_v51, %v600_v48 }
 0x11e   :  { %v389_v46 = vpop.f32.mrf.mxu0  ;;  %v566_v47 = vpop.f32.mrf.mxu1  ;;  %v671_v35 = vsub.s32 %v668_v29, %v816_v1 }
 0x11f   :  { %v567_v50 = vadd.f32 %v566_v47, %v389_v46  ;;  %v602_v55 = vmul.f32 %v563_v44, %v563_v44  ;;  %v619_v61 = vadd.f32 %v618_v54, %v601_v49 }
 0x120   :  { %v391_v52 = vpop.f32.mrf.mxu0  ;;  %v568_v53 = vpop.f32.mrf.mxu1 }
 0x121   :  { %v603_v56 = vmul.f32 %v567_v50, %v567_v50  ;;  %v569_v57 = vadd.f32 %v568_v53, %v391_v52  ;;  %v640_v4 = vadd.f32 %v639_v60, %v602_v55 }
 0x122   :  { %v393_v58 = vpop.f32.mrf.mxu0  ;;  %v570_v59 = vpop.f32.mrf.mxu1 }
 0x123   :  { %v604_v62 = vmul.f32 %v569_v57, %v569_v57  ;;  %v571_v63 = vadd.f32 %v570_v59, %v393_v58  ;;  %v620_v6 = vadd.f32 %v619_v61, %v603_v56 }
 0x124   :  { %v395_v2 = vpop.f32.mrf.mxu0  ;;  %v572_v3 = vpop.f32.mrf.mxu1 }
 0x125   :  { %v605_v9 = vmul.f32 %v571_v63, %v571_v63  ;;  %v573_v10 = vadd.f32 %v572_v3, %v395_v2  ;;  %v641_v7 = vadd.f32 %v640_v4, %v604_v62 }
 0x127   :  { %v621_v8 = vadd.f32 %v620_v6, %v605_v9  ;;  %v606_v17 = vmul.f32 %v573_v10, %v573_v10 }
 0x129   :  { %v622_v11 = vrot.slane %v621_v8, 4  ;;  %v642_v16 = vadd.f32 %v641_v7, %v606_v17 }
 0x12b   :  { %v623_v12 = vadd.f32 %v622_v11, %v621_v8  ;;  %v643_v19 = vrot.slane %v642_v16, 4 }
 0x12d   :  { %v624_v20 = vrot.slane %v623_v12, 2  ;;  %v644_v21 = vadd.f32 %v643_v19, %v642_v16 }
 0x12f   :  { %v625_v22 = vadd.f32 %v624_v20, %v623_v12  ;;  %v645_v13 = vrot.slane %v644_v21, 2 }
 0x131   :  { %v626_v23 = vrot.slane %v625_v22, 1  ;;  %v646_v24 = vadd.f32 %v645_v13, %v644_v21 }
 0x133   :  { %v627_v25 = vadd.f32 %v626_v23, %v625_v22  ;;  %v647_v26 = vrot.slane %v646_v24, 1 }
 0x135   :  { %773 = vrsqrt.f32 %v627_v25  ;;  %v648_v14 = vadd.f32 %v647_v26, %v646_v24  ;;  %vm651_vm1 = vcmp.eq.f32.partialorder %v627_v25, inf  ;;  %v654_v33 = vand.u32 2147483648, %v627_v25 }
 0x136   :  { %vm653_vm3 = vcmp.eq.f32.partialorder %v627_v25, 0.0 }
 0x137   :  { %775 = vrsqrt.f32 %v648_v14  ;;  %vm658_vm2 = vcmp.eq.f32.partialorder %v648_v14, inf  ;;  %v661_v34 = vand.u32 2147483648, %v648_v14  ;;  %vm660_vm4 = vcmp.eq.f32.partialorder %v648_v14, 0.0 }
 0x142   :  { %v774_v15 = vpop.eup %773 }
 0x143   :  { %v650_v18 = vmul.f32 %v774_v15, %v627_v25 }
 0x144   :  { %v776_v30 = vpop.eup %775 }
 0x145   :  { %v652_v31 = vsel %vm651_vm1, %v627_v25, %v650_v18  ;;  %v657_v32 = vmul.f32 %v776_v30, %v648_v14 }
 0x146   :  { %v655_v37 = vsel %vm653_vm3, %v654_v33, %v652_v31 }
 0x147   :  { %v659_v36 = vsel %vm658_vm2, %v648_v14, %v657_v32 }
 0x148   :  { %v662_v38 = vsel %vm660_vm4, %v661_v34, %v659_v36 }
 0x149   :  { %v665_v39 = vcombine.low %v655_v37, %v662_v38 }
 0x14b   :  { %v672_v40 = vrot.slane %v665_v39, %v671_v35 }
 0x14d   :  { %v679_v41 = vrot.slane %v672_v40, %v671_v35 }
 0x14f   :  { %685 = vst.msk [vmem:[%s1025_s6] sm:$0x3] %vm683_vm5, %v679_v41 }

</bundles_post_ra>
